<compile_context>
chip_gen: v7x
topology: tpu7x:2x2x1
jax: 0.10.0
libtpu: 0.0.40
codegen_flags: <defaults>
</compile_context>

<pallas_src>
import jax
import jax.numpy as jnp
from jax.experimental import pallas as pl
from jax.experimental.pallas import tpu as pltpu


# ---------------------------------------------------------------------------
# Fused kernel: encoder (Linear + ReLU) + obs_H (Linear) for all rows of the
# tile, plus the explicit transfer operator (A x + b) for the last-timestep
# rows of the trajectories covered by this tile.
# ---------------------------------------------------------------------------
def observable_fused_kernel(
    x_ref,        # [TM, D_IN]   flattened (batch*time) rows, f32 (cast to bf16 here)
    x_last_ref,   # [NB, D_IN]   last-timestep rows of the NB trajectories in this tile
    w_enc_ref,    # [D_IN, F]    encoder weight, bf16
    b_enc_ref,    # [1, F]       encoder bias, f32
    w_h_ref,      # [F, OBS]     obs_H weight, bf16
    b_h_ref,      # [1, OBS]     obs_H bias, f32
    w_a_ref,      # [OBS, OBS]   transfer operator A, bf16
    b_a_ref,      # [1, OBS]     transfer operator bias, f32
    obs_h_ref,    # out: [TM, OBS]  obs_state_H rows, f32
    prime_ref,    # out: [NB, OBS]  obs_state_H_prime rows, f32
):
    bf = jnp.bfloat16

    # --- encoder + obs_H over the whole tile (bf16 operands, f32 MXU accumulation)
    x = x_ref[...].astype(bf)
    feats = jnp.dot(x, w_enc_ref[...], preferred_element_type=jnp.float32)
    feats = jnp.maximum(feats + b_enc_ref[...], 0.0)
    obs_h = jnp.dot(feats.astype(bf), w_h_ref[...], preferred_element_type=jnp.float32)
    obs_h_ref[...] = (obs_h + b_h_ref[...]).astype(obs_h_ref.dtype)

    # --- transfer operator, last timestep of each trajectory in this tile.
    # Recomputed from x_last (per-row dot products are identical to the full-tile
    # matmul above), so no strided in-kernel gather and no second pallas_call.
    xl = x_last_ref[...].astype(bf)
    fl = jnp.dot(xl, w_enc_ref[...], preferred_element_type=jnp.float32)
    fl = jnp.maximum(fl + b_enc_ref[...], 0.0)
    hl = jnp.dot(fl.astype(bf), w_h_ref[...], preferred_element_type=jnp.float32)
    hl = hl + b_h_ref[...]
    pred = jnp.dot(hl.astype(bf), w_a_ref[...], preferred_element_type=jnp.float32)
    prime_ref[...] = (pred + b_a_ref[...]).astype(prime_ref.dtype)


# ---------------------------------------------------------------------------
# Row-tile heuristic (generation-aware, per review).
# ---------------------------------------------------------------------------
_MAX_TILE_ROWS = 1024  # 512 -> ~85%, 1024 -> ~86% of HBM roofline for tiled mem-bound work


def _pick_row_tile(n_rows, t_len, max_rows=_MAX_TILE_ROWS):
    """Pick the per-grid-step row tile.

    * n_rows <= max_rows: ONE grid step covering the whole array (block shape equals
      the full array dims, so no (8,128) divisibility constraints; best on 1-TC
      v5e/v6e, fine for small N on v7x).
    * larger n_rows: largest divisor of n_rows of the form k*8*t_len <= max_rows
      (tiles cover whole trajectories, per-tile batch count is sublane-aligned),
      preferring an even number of grid steps for v7x's two TensorCores.
    """
    if n_rows <= max_rows:
        return n_rows
    step = 8 * t_len
    cands = [c for c in range(step, max_rows + 1, step) if n_rows % c == 0]
    if not cands:
        # TODO(synk): very large N with an awkward T (no k*8*T divisor <= max_rows);
        # fall back to a single whole-array step (VMEM becomes the limit eventually).
        return n_rows
    even = [c for c in cands if (n_rows // c) % 2 == 0]
    return max(even) if even else max(cands)


# ---------------------------------------------------------------------------
# Parameter prep (hoisted out of the per-call path).
# ---------------------------------------------------------------------------
def prepare_params(params):
    """One-time prep: bf16 weights for the MXU, f32 biases. Call once and reuse."""
    w_enc, b_enc, w_h, b_h, w_a, b_a = params
    bf = jnp.bfloat16
    f32 = jnp.float32
    return (w_enc.astype(bf), b_enc.astype(f32),
            w_h.astype(bf), b_h.astype(f32),
            w_a.astype(bf), b_a.astype(f32))


def observable_net_forward(x, params, *, row_tile=None):
    """x: [B, T, D_in]. params: ideally from prepare_params (bf16 weights).
    Returns (obs_state_H [B, T, OBS] f32, obs_state_H_prime [B, OBS] f32)."""
    B, T, D_in = x.shape
    w_enc, b_enc, w_h, b_h, w_a, b_a = params
    # dtype no-ops when params are already prepared
    w_enc = w_enc.astype(jnp.bfloat16)
    w_h = w_h.astype(jnp.bfloat16)
    w_a = w_a.astype(jnp.bfloat16)
    F = w_enc.shape[1]
    OBS = w_h.shape[1]

    N = B * T
    if row_tile is None:
        row_tile = _pick_row_tile(N, T)
    assert N % row_tile == 0 and row_tile % T == 0, (N, T, row_tile)
    nb = row_tile // T          # trajectories per tile
    steps = N // row_tile

    x2d = x.reshape(N, D_in)
    x_last = x[:, -1, :]        # [B, D_in] — tiny slice, fuses under jit

    rows = lambda i: (i, 0)     # row tiles marching down the flattened rows
    full = lambda i: (0, 0)     # resident operands: constant block index, no re-fetch

    obs_h2d, prime = pl.pallas_call(
        observable_fused_kernel,
        out_shape=(
            # TODO(synk): emit bf16 here if downstream tolerates it (halves writeback,
            # biggest win on v5e's ~0.8 TB/s HBM).
            jax.ShapeDtypeStruct((N, OBS), jnp.float32),
            jax.ShapeDtypeStruct((B, OBS), jnp.float32),
        ),
        grid_spec=pltpu.PrefetchScalarGridSpec(
            num_scalar_prefetch=0,
            grid=(steps,),
            in_specs=[
                pl.BlockSpec((row_tile, D_in), rows),   # x rows
                pl.BlockSpec((nb, D_in), rows),         # last-timestep x rows
                pl.BlockSpec((D_in, F), full),          # w_enc (bf16)
                pl.BlockSpec((1, F), full),             # b_enc (f32)
                pl.BlockSpec((F, OBS), full),           # w_h (bf16)
                pl.BlockSpec((1, OBS), full),           # b_h (f32)
                pl.BlockSpec((OBS, OBS), full),         # w_a (bf16)
                pl.BlockSpec((1, OBS), full),           # b_a (f32)
            ],
            out_specs=(
                pl.BlockSpec((row_tile, OBS), rows),    # obs_state_H rows (unpadded)
                pl.BlockSpec((nb, OBS), rows),          # obs_state_H_prime rows
            ),
        ),
        compiler_params=pltpu.CompilerParams(
            dimension_semantics=("parallel",),
        ),
    )(x2d, x_last, w_enc, b_enc, w_h, b_h, w_a, b_a)

    return obs_h2d.reshape(B, T, OBS), prime


# ---------------------------------------------------------------------------
# Synthetic params + plain-JAX reference (same rounding points as the kernel).
# ---------------------------------------------------------------------------
def init_params(key, d_in, feat, obs_dim):
    """Deterministic synthetic parameters (PyTorch-Linear-like scales), stored [in, out]."""
    ks = jax.random.split(key, 6)
    s_enc = 1.0 / jnp.sqrt(d_in)
    s_h = 1.0 / jnp.sqrt(feat)
    s_a = 1.0 / jnp.sqrt(obs_dim)
    w_enc = jax.random.uniform(ks[0], (d_in, feat), jnp.float32, -s_enc, s_enc)
    b_enc = jax.random.uniform(ks[1], (1, feat), jnp.float32, -s_enc, s_enc)
    w_h = jax.random.uniform(ks[2], (feat, obs_dim), jnp.float32, -s_h, s_h)
    b_h = jax.random.uniform(ks[3], (1, obs_dim), jnp.float32, -s_h, s_h)
    w_a = jax.random.uniform(ks[4], (obs_dim, obs_dim), jnp.float32, -s_a, s_a)
    b_a = jax.random.uniform(ks[5], (1, obs_dim), jnp.float32, -s_a, s_a)
    return (w_enc, b_enc, w_h, b_h, w_a, b_a)


def reference_forward(x, params):
    """Plain-JAX reference with explicitly pinned bf16-operand / f32-accumulate matmuls
    (identical rounding points to the kernel; no reliance on default matmul precision)."""
    w_enc, b_enc, w_h, b_h, w_a, b_a = params
    bf = jnp.bfloat16
    f32 = jnp.float32
    feats = jnp.dot(x.astype(bf), w_enc.astype(bf), preferred_element_type=f32)
    feats = jnp.maximum(feats + b_enc[0].astype(f32), 0.0)
    obs_h = jnp.dot(feats.astype(bf), w_h.astype(bf), preferred_element_type=f32)
    obs_h = obs_h + b_h[0].astype(f32)
    h_last = obs_h[:, -1, :]
    pred = jnp.dot(h_last.astype(bf), w_a.astype(bf), preferred_element_type=f32)
    pred = pred + b_a[0].astype(f32)
    return obs_h, pred


if __name__ == "__main__":
    # small shapes implied by the forward: batch=2, time=8, input dim=16,
    # encoder feature dim=32, observable dim=32
    B, T, D_IN, FEAT, OBS = 2, 8, 16, 32, 32

    key = jax.random.PRNGKey(0)
    k_x, k_p = jax.random.split(key)
    x = jax.random.normal(k_x, (B, T, D_IN), dtype=jnp.float32)
    params = init_params(k_p, D_IN, FEAT, OBS)
    prepared = prepare_params(params)        # one-time weight prep (hoisted out of forward)

    fwd = jax.jit(observable_net_forward)
    obs_H, obs_H_prime = fwd(x, prepared)
    obs_H = jax.block_until_ready(obs_H)
    obs_H_prime = jax.block_until_ready(obs_H_prime)

    # sanity check against the plain-JAX reference (same bf16 rounding points)
    ref_H, ref_Hp = reference_forward(x, params)
    assert obs_H.shape == (B, T, OBS)
    assert obs_H_prime.shape == (B, OBS)
    assert jnp.allclose(obs_H, ref_H, atol=1e-4, rtol=1e-4)
    assert jnp.allclose(obs_H_prime, ref_Hp, atol=1e-3, rtol=1e-3)

    print("KERNEL_OK")
</pallas_src>

<mosaic_0001>
module attributes {stable_mosaic.version = 11 : i64} {
  func.func @observable_fused_kernel(%arg0: i32, %arg1: memref<16x16xf32, #tpu.memory_space<vmem>>, %arg2: memref<2x16xf32, #tpu.memory_space<vmem>>, %arg3: memref<16x32xbf16, #tpu.memory_space<vmem>>, %arg4: memref<1x32xf32, #tpu.memory_space<vmem>>, %arg5: memref<32x32xbf16, #tpu.memory_space<vmem>>, %arg6: memref<1x32xf32, #tpu.memory_space<vmem>>, %arg7: memref<32x32xbf16, #tpu.memory_space<vmem>>, %arg8: memref<1x32xf32, #tpu.memory_space<vmem>>, %arg9: memref<16x32xf32, #tpu.memory_space<vmem>>, %arg10: memref<2x32xf32, #tpu.memory_space<vmem>>) attributes {dimension_semantics = [#tpu.dimension_semantics<parallel>], iteration_bounds = array<i64: 1>, scalar_prefetch = 0 : i64, scratch_operands = 0 : i64, tpu.core_type = #tpu.core_type<tc>, window_params = [{transform_indices = @transform_0, window_bounds = array<i64: 16, 16>}, {transform_indices = @transform_1, window_bounds = array<i64: 2, 16>}, {pipeline_mode = #tpu.pipeline_mode<synchronous>, transform_indices = @transform_2, window_bounds = array<i64: 16, 32>}, {pipeline_mode = #tpu.pipeline_mode<synchronous>, transform_indices = @transform_3, window_bounds = array<i64: 1, 32>}, {pipeline_mode = #tpu.pipeline_mode<synchronous>, transform_indices = @transform_4, window_bounds = array<i64: 32, 32>}, {pipeline_mode = #tpu.pipeline_mode<synchronous>, transform_indices = @transform_5, window_bounds = array<i64: 1, 32>}, {pipeline_mode = #tpu.pipeline_mode<synchronous>, transform_indices = @transform_6, window_bounds = array<i64: 32, 32>}, {pipeline_mode = #tpu.pipeline_mode<synchronous>, transform_indices = @transform_7, window_bounds = array<i64: 1, 32>}, {transform_indices = @transform_8, window_bounds = array<i64: 16, 32>}, {transform_indices = @transform_9, window_bounds = array<i64: 2, 32>}]} {
    %c0 = arith.constant 0 : index
    %c0_0 = arith.constant 0 : index
    %0 = vector.load %arg1[%c0, %c0_0] : memref<16x16xf32, #tpu.memory_space<vmem>>, vector<16x16xf32>
    %1 = arith.truncf %0 : vector<16x16xf32> to vector<16x16xbf16>
    %c0_1 = arith.constant 0 : index
    %c0_2 = arith.constant 0 : index
    %2 = vector.load %arg3[%c0_1, %c0_2] : memref<16x32xbf16, #tpu.memory_space<vmem>>, vector<16x32xbf16>
    %cst = arith.constant dense<0.000000e+00> : vector<16x32xf32>
    %3 = tpu.matmul %1, %2, %cst {dimension_numbers = #tpu.dot_dimension_numbers<[1], [0], [0], [1], [0, 0, 1, 1], [], []>} : vector<16x16xbf16>, vector<16x32xbf16>, vector<16x32xf32> -> vector<16x32xf32>
    %c0_3 = arith.constant 0 : index
    %c0_4 = arith.constant 0 : index
    %4 = vector.load %arg4[%c0_3, %c0_4] : memref<1x32xf32, #tpu.memory_space<vmem>>, vector<1x32xf32>
    %5 = vector.broadcast %4 : vector<1x32xf32> to vector<16x32xf32>
    %6 = arith.addf %3, %5 : vector<16x32xf32>
    %cst_5 = arith.constant 0.000000e+00 : f32
    %7 = vector.broadcast %cst_5 : f32 to vector<16x32xf32>
    %8 = arith.maximumf %6, %7 : vector<16x32xf32>
    %9 = arith.truncf %8 : vector<16x32xf32> to vector<16x32xbf16>
    %c0_6 = arith.constant 0 : index
    %c0_7 = arith.constant 0 : index
    %10 = vector.load %arg5[%c0_6, %c0_7] : memref<32x32xbf16, #tpu.memory_space<vmem>>, vector<32x32xbf16>
    %cst_8 = arith.constant dense<0.000000e+00> : vector<16x32xf32>
    %11 = tpu.matmul %9, %10, %cst_8 {dimension_numbers = #tpu.dot_dimension_numbers<[1], [0], [0], [1], [0, 0, 1, 1], [], []>} : vector<16x32xbf16>, vector<32x32xbf16>, vector<16x32xf32> -> vector<16x32xf32>
    %c0_9 = arith.constant 0 : index
    %c0_10 = arith.constant 0 : index
    %12 = vector.load %arg6[%c0_9, %c0_10] : memref<1x32xf32, #tpu.memory_space<vmem>>, vector<1x32xf32>
    %13 = vector.broadcast %12 : vector<1x32xf32> to vector<16x32xf32>
    %14 = arith.addf %11, %13 : vector<16x32xf32>
    %c0_11 = arith.constant 0 : index
    %c0_12 = arith.constant 0 : index
    %15 = vector.load %arg9[%c0_11, %c0_12] : memref<16x32xf32, #tpu.memory_space<vmem>>, vector<16x32xf32>
    tpu.vector_store %arg9[%c0_11, %c0_12], %14 {strides = array<i32>} : memref<16x32xf32, #tpu.memory_space<vmem>>, vector<16x32xf32>,
    %c0_13 = arith.constant 0 : index
    %c0_14 = arith.constant 0 : index
    %16 = vector.load %arg2[%c0_13, %c0_14] : memref<2x16xf32, #tpu.memory_space<vmem>>, vector<2x16xf32>
    %17 = arith.truncf %16 : vector<2x16xf32> to vector<2x16xbf16>
    %c0_15 = arith.constant 0 : index
    %c0_16 = arith.constant 0 : index
    %18 = vector.load %arg3[%c0_15, %c0_16] : memref<16x32xbf16, #tpu.memory_space<vmem>>, vector<16x32xbf16>
    %cst_17 = arith.constant dense<0.000000e+00> : vector<2x32xf32>
    %19 = tpu.matmul %17, %18, %cst_17 {dimension_numbers = #tpu.dot_dimension_numbers<[1], [0], [0], [1], [0, 0, 1, 1], [], []>} : vector<2x16xbf16>, vector<16x32xbf16>, vector<2x32xf32> -> vector<2x32xf32>
    %c0_18 = arith.constant 0 : index
    %c0_19 = arith.constant 0 : index
    %20 = vector.load %arg4[%c0_18, %c0_19] : memref<1x32xf32, #tpu.memory_space<vmem>>, vector<1x32xf32>
    %21 = vector.broadcast %20 : vector<1x32xf32> to vector<2x32xf32>
    %22 = arith.addf %19, %21 : vector<2x32xf32>
    %cst_20 = arith.constant 0.000000e+00 : f32
    %23 = vector.broadcast %cst_20 : f32 to vector<2x32xf32>
    %24 = arith.maximumf %22, %23 : vector<2x32xf32>
    %25 = arith.truncf %24 : vector<2x32xf32> to vector<2x32xbf16>
    %c0_21 = arith.constant 0 : index
    %c0_22 = arith.constant 0 : index
    %26 = vector.load %arg5[%c0_21, %c0_22] : memref<32x32xbf16, #tpu.memory_space<vmem>>, vector<32x32xbf16>
    %cst_23 = arith.constant dense<0.000000e+00> : vector<2x32xf32>
    %27 = tpu.matmul %25, %26, %cst_23 {dimension_numbers = #tpu.dot_dimension_numbers<[1], [0], [0], [1], [0, 0, 1, 1], [], []>} : vector<2x32xbf16>, vector<32x32xbf16>, vector<2x32xf32> -> vector<2x32xf32>
    %c0_24 = arith.constant 0 : index
    %c0_25 = arith.constant 0 : index
    %28 = vector.load %arg6[%c0_24, %c0_25] : memref<1x32xf32, #tpu.memory_space<vmem>>, vector<1x32xf32>
    %29 = vector.broadcast %28 : vector<1x32xf32> to vector<2x32xf32>
    %30 = arith.addf %27, %29 : vector<2x32xf32>
    %31 = arith.truncf %30 : vector<2x32xf32> to vector<2x32xbf16>
    %c0_26 = arith.constant 0 : index
    %c0_27 = arith.constant 0 : index
    %32 = vector.load %arg7[%c0_26, %c0_27] : memref<32x32xbf16, #tpu.memory_space<vmem>>, vector<32x32xbf16>
    %cst_28 = arith.constant dense<0.000000e+00> : vector<2x32xf32>
    %33 = tpu.matmul %31, %32, %cst_28 {dimension_numbers = #tpu.dot_dimension_numbers<[1], [0], [0], [1], [0, 0, 1, 1], [], []>} : vector<2x32xbf16>, vector<32x32xbf16>, vector<2x32xf32> -> vector<2x32xf32>
    %c0_29 = arith.constant 0 : index
    %c0_30 = arith.constant 0 : index
    %34 = vector.load %arg8[%c0_29, %c0_30] : memref<1x32xf32, #tpu.memory_space<vmem>>, vector<1x32xf32>
    %35 = vector.broadcast %34 : vector<1x32xf32> to vector<2x32xf32>
    %36 = arith.addf %33, %35 : vector<2x32xf32>
    %c0_31 = arith.constant 0 : index
    %c0_32 = arith.constant 0 : index
    %37 = vector.load %arg10[%c0_31, %c0_32] : memref<2x32xf32, #tpu.memory_space<vmem>>, vector<2x32xf32>
    tpu.vector_store %arg10[%c0_31, %c0_32], %36 {strides = array<i32>} : memref<2x32xf32, #tpu.memory_space<vmem>>, vector<2x32xf32>,
    return
  }
  func.func @transform_0(%arg0: i32) -> (i32, i32) {
    %c0_i32 = arith.constant 0 : i32
    %c0_i32_0 = arith.constant 0 : i32
    return %arg0, %c0_i32 : i32, i32
  }
  func.func @transform_1(%arg0: i32) -> (i32, i32) {
    %c0_i32 = arith.constant 0 : i32
    %c0_i32_0 = arith.constant 0 : i32
    return %arg0, %c0_i32 : i32, i32
  }
  func.func @transform_2(%arg0: i32) -> (i32, i32) {
    %c0_i32 = arith.constant 0 : i32
    %c0_i32_0 = arith.constant 0 : i32
    %c0_i32_1 = arith.constant 0 : i32
    return %c0_i32, %c0_i32_0 : i32, i32
  }
  func.func @transform_3(%arg0: i32) -> (i32, i32) {
    %c0_i32 = arith.constant 0 : i32
    %c0_i32_0 = arith.constant 0 : i32
    %c0_i32_1 = arith.constant 0 : i32
    return %c0_i32, %c0_i32_0 : i32, i32
  }
  func.func @transform_4(%arg0: i32) -> (i32, i32) {
    %c0_i32 = arith.constant 0 : i32
    %c0_i32_0 = arith.constant 0 : i32
    %c0_i32_1 = arith.constant 0 : i32
    return %c0_i32, %c0_i32_0 : i32, i32
  }
  func.func @transform_5(%arg0: i32) -> (i32, i32) {
    %c0_i32 = arith.constant 0 : i32
    %c0_i32_0 = arith.constant 0 : i32
    %c0_i32_1 = arith.constant 0 : i32
    return %c0_i32, %c0_i32_0 : i32, i32
  }
  func.func @transform_6(%arg0: i32) -> (i32, i32) {
    %c0_i32 = arith.constant 0 : i32
    %c0_i32_0 = arith.constant 0 : i32
    %c0_i32_1 = arith.constant 0 : i32
    return %c0_i32, %c0_i32_0 : i32, i32
  }
  func.func @transform_7(%arg0: i32) -> (i32, i32) {
    %c0_i32 = arith.constant 0 : i32
    %c0_i32_0 = arith.constant 0 : i32
    %c0_i32_1 = arith.constant 0 : i32
    return %c0_i32, %c0_i32_0 : i32, i32
  }
  func.func @transform_8(%arg0: i32) -> (i32, i32) {
    %c0_i32 = arith.constant 0 : i32
    %c0_i32_0 = arith.constant 0 : i32
    return %arg0, %c0_i32 : i32, i32
  }
  func.func @transform_9(%arg0: i32) -> (i32, i32) {
    %c0_i32 = arith.constant 0 : i32
    %c0_i32_0 = arith.constant 0 : i32
    return %arg0, %c0_i32 : i32, i32
  }
}

</mosaic_0001>

<bundles_post_ra>
// kernel: observable_net_forward.1
= control target key start
LH: loop header
LB: loop body
LE: loop exit
PB: predicated region body
PF: predicated region fallthrough
CT: control target
= control target key end

     0   :  { %15 = vsyncpa [#allocation3], 0  ;;  %s807_s0 = inlined_call_operand.vmem [shape: f32[16,16], index: 0, kind: input, shape index: {}]   ;;  %s808_s1 = inlined_call_operand.vmem [shape: f32[2,16], index: 1, kind: input, shape index: {}]   ;;  %s809_s2 = inlined_call_operand.hbm [shape: bf16[16,32], index: 2, kind: input, shape index: {}]   ;;  %s810_s3 = inlined_call_operand.vmem [shape: f32[1,32], index: 3, kind: input, shape index: {}]   ;;  %s811_s4 = inlined_call_operand.vmem [shape: bf16[32,32], index: 4, kind: input, shape index: {}]   ;;  %s812_s5 = inlined_call_operand.vmem [shape: f32[1,32], index: 5, kind: input, shape index: {}]   ;;  %s813_s6 = inlined_call_operand.hbm [shape: bf16[32,32], index: 6, kind: input, shape index: {}]   ;;  %s814_s7 = inlined_call_operand.hbm [shape: f32[1,32], index: 7, kind: input, shape index: {}]   ;;  %s815_s8 = inlined_call_operand.hbm [shape: f32[16,32], index: 8, kind: output, shape index: {0}]   ;;  %s816_s9 = inlined_call_operand.hbm [shape: f32[2,32], index: 9, kind: output, shape index: {1}]  }
   0x1   :  { %16 = vsyncpa [#allocation6], 0 }
   0x2   :  { %17 = vsyncpa [#allocation4], 0 }
   0x3   :  { %18 = vsyncpa [#allocation10], 0  ;;  %s642_s30 = smov [#allocation5]   ;;  %s643_s11 = smov [#allocation2]  }
   0x4   :  { %s46_s10 = sshll.u32 %s642_s30, 4  ;;  %s28_s12 = sshll.u32 %s643_s11, 4  ;;  %s47_s10 = int_to_ptr.vmem [resolvable:$true] %s46_s10  ;;  %s703_s12 = int_to_ptr.vmem [resolvable:$true] %s28_s12 }
   0x5   :  { %s524_s15 = scalar_lea.hbm %s813_s6, 256 }
   0x6   :  { %p525_p0 = scmp.ne.s32.totalorder %s813_s6, %s524_s15  ;;  %p528_p1 = scmp.lt.u32.totalorder %s524_s15, %s813_s6 }
   0x8   :  { %p530_p2 = pnand %p528_p1, %p525_p0 }
   0xa   :  { %533 = shalt.err (!%p530_p2)
}
   0xb   :  { %s534_s20 = scalar_lea.vmem %s47_s10, 256  ;;  %p539_p4 = scmp.lt.s32.totalorder %s47_s10, %s47_s10 }
   0xc   :  { %p535_p3 = scmp.ne.s32.totalorder %s47_s10, %s534_s20  ;;  %p540_p5 = scmp.lt.s32.totalorder %s534_s20, %s534_s20 }
   0xe   :  { %p541_p6 = por %p540_p5, %p539_p4 }
  0x10   :  { %p542_p7 = pnand %p541_p6, %p535_p3 }
  0x12   :  { %545 = shalt.err (!%p542_p7)
}
  0x13   :  { %s644_s21 = smov 64   ;;  %s645_s22 = smov 4  }
  0x14   :  { %52 = dma.hbm_to_vmem [thread:$0]  %s813_s6, 256, %s47_s10, [#allocation6], %s644_s21, %s644_s21, %s645_s22  }
  0x15   :  { %s546_s27 = scalar_lea.hbm %s809_s2, 128 }
  0x16   :  { %p547_p8 = scmp.ne.s32.totalorder %s809_s2, %s546_s27  ;;  %p550_p9 = scmp.lt.u32.totalorder %s546_s27, %s809_s2 }
  0x18   :  { %p552_p10 = pnand %p550_p9, %p547_p8 }
  0x1a   :  { %555 = shalt.err (!%p552_p10)
}
  0x1b   :  { %s556_s13 = scalar_lea.vmem %s703_s12, 128  ;;  %p561_p12 = scmp.lt.s32.totalorder %s703_s12, %s703_s12 }
  0x1c   :  { %p557_p11 = scmp.ne.s32.totalorder %s703_s12, %s556_s13  ;;  %p562_p13 = scmp.lt.s32.totalorder %s556_s13, %s556_s13 }
  0x1e   :  { %p563_p0 = por %p562_p13, %p561_p12 }
  0x20   :  { %p564_p1 = pnand %p563_p0, %p557_p11 }
  0x22   :  { %567 = shalt.err (!%p564_p1)
}
  0x23   :  { %34 = dma.hbm_to_vmem [thread:$0]  %s809_s2, 128, %s703_s12, [#allocation3], %s644_s21, %s644_s21, %s645_s22  }
  0x24   :  { %s646_s14 = smov [#allocation7]   ;;  %s568_s18 = scalar_lea.hbm %s814_s7, 16 }
  0x25   :  { %s59_s15 = sshll.u32 %s646_s14, 4  ;;  %p569_p2 = scmp.ne.s32.totalorder %s814_s7, %s568_s18  ;;  %s60_s15 = int_to_ptr.vmem [resolvable:$true] %s59_s15 }
  0x26   :  { %p572_p3 = scmp.lt.u32.totalorder %s568_s18, %s814_s7 }
  0x28   :  { %p574_p4 = pnand %p572_p3, %p569_p2 }
  0x2a   :  { %577 = shalt.err (!%p574_p4)
}
  0x2b   :  { %s578_s25 = scalar_lea.vmem %s60_s15, 16  ;;  %s582_s2 = scalar_lea.vmem %s60_s15, 32 }
  0x2c   :  { %p579_p5 = scmp.ne.s32.totalorder %s60_s15, %s578_s25  ;;  %p583_p6 = scmp.lt.s32.totalorder %s60_s15, %s60_s15 }
  0x2d   :  { %p584_p7 = scmp.lt.s32.totalorder %s582_s2, %s578_s25 }
  0x2f   :  { %p585_p8 = por %p584_p7, %p583_p6 }
  0x31   :  { %p586_p9 = pnand %p585_p8, %p579_p5 }
  0x33   :  { %589 = shalt.err (!%p586_p9)
}
  0x34   :  { %62 = dma.hbm_to_vmem [thread:$0]  %s814_s7, 16, %s60_s15, [#allocation6]  }
  0x35   :  { %634 = dma.done.wait [#allocation3], 128  }
  0x36   :  { %635 = vsyncadd [#allocation3], 4294967168 }
  0x37   :  { %636 = dma.done.wait [#allocation6], 272  }
  0x38   :  { %637 = vsyncadd [#allocation6], 4294967024  ;;  %v647_v0 = vmov 0.0   ;;  %vm648_vm0 = vmmov 0   ;;  %v516_v1 = vld [vmem:[#allocation2] sm:$0xff]   ;;  %v74_v3 = vld [vmem:[%s807_s0 + $0x8] sm:$0xff] }
  0x39   :  { %469 = vmatprep.subr.bf16.mxu0 %v647_v0  ;;  %471 = vmatprep.mubr.msk.bf16.mxu0 %vm648_vm0, %v647_v0  ;;  %v73_v2 = vld [vmem:[%s807_s0] sm:$0xff]  ;;  %vm91_vm1 = vcmask 130048   ;;  %v519_v9 = vld [vmem:[%s811_s4 + $0x8] sm:$0xff]   ;;  %vm162_vm2 = vcmask 261120   ;;  %v523_v30 = vld [vmem:[#allocation5 + $0x8] sm:$0xff]  }
  0x3a   :  { %475 = vmatprep.subr.bf16.mxu1 %v647_v0  ;;  %479 = vmatprep.mubr.msk.bf16.mxu1 %vm648_vm0, %v647_v0  ;;  %v75_v4 = vpack.c.bf16 %v74_v3, %v73_v2  ;;  %v517_v5 = vld [vmem:[#allocation2] sm:$0xff]   ;;  %v521_v25 = vld [vmem:[%s811_s4 + $0x8] sm:$0xff]  }
  0x3b   :  { %470 = vmatpush3.bf16.msra.mxu0 %v516_v1  ;;  %v209_v6 = vld [vmem:[%s808_s1] sm:$0x3]  ;;  %v522_v29 = vld [vmem:[#allocation5] sm:$0xff]  }
  0x3c   :  { %483 = vmatprep.subr.bf16.mxu0 %v647_v0  ;;  %v210_v7 = vpack.c.bf16 %v209_v6, %v209_v6  ;;  %v518_v8 = vld [vmem:[%s811_s4] sm:$0xff]  }
  0x3d   :  { %476 = vmatpush3.bf16.msra.mxu1 %v518_v8  ;;  %v438_v10 = vld [vmem:[%s810_s3] ss:$0 sm:$0xff] }
  0x3e   :  { %472 = vmatmul.mubr.msk.bf16.vlgmr.msra.gmra.mrb[0].mxu0 %vm91_vm1, %v75_v4  ;;  %477 = vmatprep.subr.bf16.mxu1 %v647_v0  ;;  %v520_v19 = vld [vmem:[%s811_s4] sm:$0xff]   ;;  %s649_s4 = smov [#allocation8]  }
  0x3f   :  { %484 = vmatpush3.bf16.msra.mxu0 %v517_v5  ;;  %485 = vmatprep.mubr.msk.bf16.mxu0 %vm648_vm0, %v647_v0  ;;  %v441_v31 = vld [vmem:[%s812_s5] ss:$0 sm:$0xff]  ;;  %s411_s5 = sshll.u32 %s649_s4, 4  ;;  %s412_s5 = int_to_ptr.vmem [resolvable:$true] %s411_s5 }
  0x40   :  { %497 = vmatprep.subr.bf16.mxu0 %v647_v0  ;;  %s590_s18 = scalar_lea.vmem %s412_s5, 256  ;;  %p595_p11 = scmp.lt.s32.totalorder %s412_s5, %s412_s5 }
  0x41   :  { %478 = vmatpush3.bf16.msra.mxu1 %v519_v9  ;;  %p591_p10 = scmp.ne.s32.totalorder %s412_s5, %s590_s18  ;;  %p596_p12 = scmp.lt.s32.totalorder %s590_s18, %s590_s18 }
  0x42   :  { %489 = vmatprep.subr.bf16.mxu1 %v647_v0 }
  0x43   :  { %p597_p13 = por %p596_p12, %p595_p11 }
  0x45   :  { %p598_p0 = pnand %p597_p13, %p591_p10 }
  0x46   :  { %486 = vmatmul.mubr.msk.bf16.vlgmr.msra.gmra.mrb[4].mxu0 %vm91_vm1, %v210_v7 }
  0x47   :  { %501 = vmatprep.mubr.msk.bf16.mxu0 %vm648_vm0, %v647_v0  ;;  %498 = vmatpush3.bf16.msra.mxu0 %v522_v29 }
  0x48   :  { %499 = vmatprep.subr.bf16.mxu0 %v647_v0 }
  0x4b   :  { %500 = vmatpush3.bf16.msra.mxu0 %v523_v30 }
 0x111   :  { %v129_v11 = vpop.f32.mrb[0].mxu0 }
 0x112   :  { %v130_v12 = vadd.f32 %v438_v10, %v129_v11  ;;  %v473_v13 = vpop.f32.mrb[1].mxu0 }
 0x113   :  { %v132_v14 = vpop.f32.mrb[2].mxu0 }
 0x114   :  { %v133_v15 = vadd.f32 %v438_v10, %v132_v14  ;;  %v474_v16 = vpop.f32.mrb[3].mxu0  ;;  %v136_v17 = vmax.f32 %v130_v12, 0.0 }
 0x116   :  { %v137_v18 = vmax.f32 %v133_v15, 0.0 }
 0x118   :  { %v138_v20 = vpack.c.bf16 %v137_v18, %v136_v17 }
 0x119   :  { %v263_v21 = vpop.f32.mrb[4].mxu0 }
 0x11a   :  { %v264_v22 = vadd.f32 %v438_v10, %v263_v21  ;;  %480 = vmatmul.mubr.msk.bf16.vlgmr.msra.gmra.mrb[0].mxu1 %vm162_vm2, %v138_v20  ;;  %v487_v23 = vpop.f32.mrb[5].mxu0 }
 0x11b   :  { %490 = vmatpush3.bf16.msra.mxu1 %v520_v19  ;;  %v266_v24 = vpop.f32.mrb[6].mxu0  ;;  %493 = vmatprep.mubr.msk.bf16.mxu1 %vm648_vm0, %v647_v0 }
 0x11c   :  { %v269_v26 = vmax.f32 %v264_v22, 0.0  ;;  %v488_v27 = vpop.f32.mrb[7].mxu0  ;;  %491 = vmatprep.subr.bf16.mxu1 %v647_v0 }
 0x11e   :  { %v270_v28 = vpack.c.bf16 %v269_v26, %v269_v26 }
 0x11f   :  { %492 = vmatpush3.bf16.msra.mxu1 %v521_v25 }
 0x122   :  { %494 = vmatmul.mubr.msk.bf16.vlgmr.msra.gmra.mrb[4].mxu1 %vm162_vm2, %v270_v28 }
 0x1ed   :  { %v200_v32 = vpop.f32.mrb[0].mxu1 }
 0x1ee   :  { %v201_v33 = vadd.f32 %v441_v31, %v200_v32  ;;  %v481_v34 = vpop.f32.mrb[1].mxu1 }
 0x1ef   :  { %v203_v35 = vpop.f32.mrb[2].mxu1 }
 0x1f0   :  { %207 = vst.msk [vmem:[#allocation8] sm:$0xff] %vm162_vm2, %v201_v33  ;;  %v204_v36 = vadd.f32 %v441_v31, %v203_v35  ;;  %v482_v37 = vpop.f32.mrb[3].mxu1 }
 0x1f2   :  { %208 = vst.msk [vmem:[#allocation8 + $0x8] sm:$0xff] %vm162_vm2, %v204_v36 }
 0x1f5   :  { %v331_v38 = vpop.f32.mrb[4].mxu1 }
 0x1f6   :  { %v332_v39 = vadd.f32 %v441_v31, %v331_v38  ;;  %v495_v40 = vpop.f32.mrb[5].mxu1 }
 0x1f7   :  { %v334_v41 = vpop.f32.mrb[6].mxu1 }
 0x1f8   :  { %v337_v42 = vpack.c.bf16 %v332_v39, %v332_v39  ;;  %v496_v43 = vpop.f32.mrb[7].mxu1 }
 0x1fa   :  { %502 = vmatmul.mubr.msk.bf16.vlgmr.msra.gmra.mrb[8].mxu0 %vm162_vm2, %v337_v42 }
 0x1fb   :  { %601 = shalt.err (!%p598_p0)
}
 0x1fc   :  { %s602_s23 = scalar_lea.hbm %s815_s8, 256 }
 0x1fd   :  { %p603_p1 = scmp.ne.s32.totalorder %s815_s8, %s602_s23  ;;  %p606_p2 = scmp.lt.u32.totalorder %s602_s23, %s815_s8 }
 0x1ff   :  { %p608_p3 = pnand %p606_p2, %p603_p1 }
 0x201   :  { %611 = shalt.err (!%p608_p3)
}
 0x202   :  { %s650_s21 = smov 128   ;;  %s651_s22 = smov 8   ;;  %v452_v44 = vld [vmem:[#allocation7] ss:$0 sm:$0xff]  ;;  %vm404_vm3 = vcmask 254976  }
 0x203   :  { %417 = dma.vmem_to_hbm [thread:$0]  %s412_s5, 256, %s815_s8, [#allocation4], %s650_s21, %s650_s21, %s651_s22  }
 0x204   :  { %s652_s28 = smov [#allocation9]  }
 0x205   :  { %s424_s7 = sshll.u32 %s652_s28, 4  ;;  %s425_s7 = int_to_ptr.vmem [resolvable:$true] %s424_s7 }
 0x206   :  { %s612_s29 = scalar_lea.vmem %s425_s7, 32  ;;  %p617_p5 = scmp.lt.s32.totalorder %s425_s7, %s425_s7 }
 0x207   :  { %p613_p4 = scmp.ne.s32.totalorder %s425_s7, %s612_s29  ;;  %p618_p6 = scmp.lt.s32.totalorder %s612_s29, %s612_s29 }
 0x209   :  { %p619_p7 = por %p618_p6, %p617_p5 }
 0x20b   :  { %p620_p8 = pnand %p619_p7, %p613_p4 }
 0x2cd   :  { %v398_v45 = vpop.f32.mrb[8].mxu0 }
 0x2ce   :  { %v399_v46 = vadd.f32 %v452_v44, %v398_v45  ;;  %v503_v47 = vpop.f32.mrb[9].mxu0 }
 0x2cf   :  { %v401_v48 = vpop.f32.mrb[10].mxu0 }
 0x2d0   :  { %v504_v49 = vpop.f32.mrb[11].mxu0  ;;  %405 = vst.msk [vmem:[#allocation9] sm:$0x3] %vm404_vm3, %v399_v46 }
 0x2d1   :  { %623 = shalt.err (!%p620_p8)
}
 0x2d2   :  { %s624_s0 = scalar_lea.hbm %s816_s9, 32 }
 0x2d3   :  { %p625_p9 = scmp.ne.s32.totalorder %s816_s9, %s624_s0  ;;  %p628_p10 = scmp.lt.u32.totalorder %s624_s0, %s816_s9 }
 0x2d5   :  { %p630_p11 = pnand %p628_p10, %p625_p9 }
 0x2d7   :  { %633 = shalt.err (!%p630_p11)
}
 0x2d8   :  { %427 = dma.vmem_to_hbm [thread:$0]  %s425_s7, 32, %s816_s9, [#allocation10]  }
 0x2d9   :  { %638 = dma.done.wait [#allocation4], 256  }
 0x2da   :  { %639 = vsyncadd [#allocation4], 4294967040 }
 0x2db   :  { %640 = dma.done.wait [#allocation10], 32  }
 0x2dc   :  { %641 = vsyncadd [#allocation10], 4294967264 }
 0x2dd   :  { %434 = vsyncpa [#allocation3], 1 }
 0x2de   :  { %435 = vsyncpa [#allocation6], 1 }
 0x2df   :  { %436 = vsyncpa [#allocation4], 1 }
 0x2e0   :  { %437 = vsyncpa [#allocation10], 1 }

</bundles_post_ra>
